<compile_context>
chip_gen: v5e
topology: v5e:2x2
jax: 0.10.0
libtpu: 0.0.40
codegen_flags: <defaults>
</compile_context>

<pallas_src>
import functools
import math

import jax
import jax.numpy as jnp
import numpy as np
from jax.experimental import pallas as pl
from jax.experimental.pallas import tpu as pltpu

# MXU compute dtype for all matmuls (accumulation always f32).  Set to
# jnp.bfloat16 for ~2-4x MXU throughput and half the HBM/VMEM traffic on
# v6e/v7x at relaxed (bf16) tolerance; kept at f32 here so the correctness
# check against the f32 reference stays tight.
_MXU_DTYPE = jnp.float32

_NEG_MASK = -1000000.0  # d2l masked_softmax fill value (NOT -inf)

_vmem_limit_cache = None


def _vmem_limit_bytes():
    """Generation-aware scoped-VMEM budget: ~3/4 of physical VMEM, capped at
    96 MiB (v5e/v6e: 128 MiB physical; v7x: 64 MiB per TensorCore)."""
    global _vmem_limit_cache
    if _vmem_limit_cache is None:
        try:
            cap = int(pltpu.get_tpu_info().vmem_capacity_bytes)
        except Exception:
            cap = 64 * 1024 * 1024  # conservative fallback (v7x per-core VMEM)
        _vmem_limit_cache = int(
            max(32 * 1024 * 1024, min(cap * 3 // 4, 96 * 1024 * 1024)))
    return _vmem_limit_cache


def _pick_tile(dim, target, align):
    """Largest tile <= target that is a multiple of `align` and divides `dim`.
    Falls back to the full dim (always a legal block size)."""
    if dim <= target:
        return dim
    t = (target // align) * align
    while t > align and dim % t:
        t -= align
    return t if (t >= align and dim % t == 0) else dim


# ----------------------------------------------------------------------------
# Tiled matmul kernel (W_o projection and the cross-attention fallback path).
# ----------------------------------------------------------------------------
def _matmul_kernel(x_ref, w_ref, o_ref, acc_ref):
    @pl.when(pl.program_id(2) == 0)
    def _init():
        acc_ref[...] = jnp.zeros_like(acc_ref)

    acc_ref[...] += jnp.dot(x_ref[...].astype(_MXU_DTYPE),
                            w_ref[...].astype(_MXU_DTYPE),
                            preferred_element_type=jnp.float32)

    @pl.when(pl.program_id(2) == pl.num_programs(2) - 1)
    def _store():
        o_ref[...] = acc_ref[...].astype(o_ref.dtype)


def linear(x2d, w, *, tm=512, tn=None, tk=None):
    """x2d: (M, K), w: (K, N) -> (M, N), tiled over M/N/K."""
    M, K = x2d.shape
    Kw, N = w.shape
    assert K == Kw
    itemsize = jnp.dtype(x2d.dtype).itemsize
    vmem_limit = _vmem_limit_bytes()
    # Weight-resident tiling: keep the whole (K, N) weight in VMEM across every
    # M tile (its BlockSpec index is then constant across consecutive steps, so
    # Pallas DMAs it only once) whenever it fits comfortably in the budget.
    if 2 * K * N * itemsize <= vmem_limit // 4:
        tk = K if tk is None else tk
        tn = N if tn is None else tn
    else:
        tk = 512 if tk is None else tk
        tn = 256 if tn is None else tn
    tm = _pick_tile(M, tm, 8)
    tk = _pick_tile(K, tk, 128)
    tn = _pick_tile(N, tn, 128)
    grid = (M // tm, N // tn, K // tk)
    cost = pl.CostEstimate(flops=2 * M * K * N, transcendentals=0,
                           bytes_accessed=(M * K + K * N + M * N) * itemsize)
    return pl.pallas_call(
        _matmul_kernel,
        out_shape=jax.ShapeDtypeStruct((M, N), x2d.dtype),
        grid=grid,
        in_specs=[
            pl.BlockSpec((tm, tk), lambda i, j, k: (i, k)),
            pl.BlockSpec((tk, tn), lambda i, j, k: (k, j)),
        ],
        out_specs=pl.BlockSpec((tm, tn), lambda i, j, k: (i, j)),
        scratch_shapes=[pltpu.VMEM((tm, tn), jnp.float32)],
        compiler_params=pltpu.CompilerParams(
            dimension_semantics=("parallel", "parallel", "arbitrary"),
            vmem_limit_bytes=vmem_limit),
        cost_estimate=cost,
    )(x2d, w)


# ----------------------------------------------------------------------------
# Fused Q/K/V projection: one pallas_call over a stacked (Sx, M, K) @ (3, K, N).
# Sx == 1 covers self-attention (same input array for q/k/v, no 3x copy).
# ----------------------------------------------------------------------------
def _qkv_matmul_kernel(x_ref, w_ref, o_ref, acc_ref):
    @pl.when(pl.program_id(3) == 0)
    def _init():
        acc_ref[...] = jnp.zeros_like(acc_ref)

    acc_ref[...] += jnp.dot(x_ref[0].astype(_MXU_DTYPE),
                            w_ref[0].astype(_MXU_DTYPE),
                            preferred_element_type=jnp.float32)

    @pl.when(pl.program_id(3) == pl.num_programs(3) - 1)
    def _store():
        o_ref[0] = acc_ref[...].astype(o_ref.dtype)


def fused_qkv_linear(xs, ws, *, tm=512, tn=None, tk=None):
    """xs: (Sx, M, K) with Sx in {1, 3}, ws: (3, K, N) -> (3, M, N)."""
    Sx, M, K = xs.shape
    Sw, Kw, N = ws.shape
    assert K == Kw and Sw == 3 and Sx in (1, 3)
    itemsize = jnp.dtype(xs.dtype).itemsize
    vmem_limit = _vmem_limit_bytes()
    if 2 * K * N * itemsize <= vmem_limit // 4:      # weight-resident tiling
        tk = K if tk is None else tk
        tn = N if tn is None else tn
    else:
        tk = 512 if tk is None else tk
        tn = 256 if tn is None else tn
    tm = _pick_tile(M, tm, 8)
    tk = _pick_tile(K, tk, 128)
    tn = _pick_tile(N, tn, 128)
    grid = (Sw, M // tm, N // tn, K // tk)
    x_map = ((lambda s, i, j, k: (s, i, k)) if Sx == 3
             else (lambda s, i, j, k: (0, i, k)))
    cost = pl.CostEstimate(
        flops=2 * Sw * M * K * N, transcendentals=0,
        bytes_accessed=(Sx * M * K + Sw * K * N + Sw * M * N) * itemsize)
    return pl.pallas_call(
        _qkv_matmul_kernel,
        out_shape=jax.ShapeDtypeStruct((Sw, M, N), xs.dtype),
        grid=grid,
        in_specs=[
            pl.BlockSpec((1, tm, tk), x_map),
            pl.BlockSpec((1, tk, tn), lambda s, i, j, k: (s, k, j)),
        ],
        out_specs=pl.BlockSpec((1, tm, tn), lambda s, i, j, k: (s, i, j)),
        scratch_shapes=[pltpu.VMEM((tm, tn), jnp.float32)],
        compiler_params=pltpu.CompilerParams(
            dimension_semantics=("parallel", "parallel", "parallel", "arbitrary"),
            vmem_limit_bytes=vmem_limit),
        cost_estimate=cost,
    )(xs, ws)


# ----------------------------------------------------------------------------
# Flash-style fused multi-head attention with masked softmax.
# Grid = (batch, Lq tiles, Lk tiles); Lk is the "arbitrary" reduction axis with
# online softmax (running max / denom / f32 accumulator in VMEM scratch).
# Heads are static d-wide lane slices of H => no head transposes anywhere.
# ----------------------------------------------------------------------------
def _attn_kernel(q_ref, k_ref, v_ref, vl_ref, o_ref, m_ref, l_ref, acc_ref,
                 *, num_heads):
    ki = pl.program_id(2)
    Bb, tLq, H = q_ref.shape
    tLk = k_ref.shape[1]
    d = H // num_heads

    @pl.when(ki == 0)
    def _init():
        m_ref[...] = jnp.full_like(m_ref, -jnp.inf)
        l_ref[...] = jnp.zeros_like(l_ref)
        acc_ref[...] = jnp.zeros_like(acc_ref)

    # Fold 1/sqrt(d) into q once (cheaper than scaling every (tLq, tLk) tile).
    scale = jnp.float32(1.0 / math.sqrt(d))
    q_all = (q_ref[...].astype(jnp.float32) * scale).astype(_MXU_DTYPE)
    k_all = k_ref[...].astype(_MXU_DTYPE)
    v_all = v_ref[...].astype(_MXU_DTYPE)

    # Additive mask bias, hoisted out of the per-head loop.  masked_softmax
    # fills masked positions with -1e6 (fully-masked rows therefore softmax to
    # a uniform distribution, matching d2l semantics).
    vl = vl_ref[...]                                             # (Bb, 1, 1) i32
    col = jax.lax.broadcasted_iota(jnp.int32, (Bb, tLq, tLk), 2) + ki * tLk
    bias = jnp.where(col < vl, 0.0, _NEG_MASK)                   # (Bb, tLq, tLk)

    # All heads of this (batch, q-tile) in one grid step (static unroll).
    for h in range(num_heads):
        sl = slice(h * d, (h + 1) * d)     # head h = lane slice of H
        hs = slice(h, h + 1)
        s = jnp.einsum("bqd,bkd->bqk", q_all[:, :, sl], k_all[:, :, sl],
                       preferred_element_type=jnp.float32) + bias
        m_prev = m_ref[:, :, hs]                                 # (Bb, tLq, 1)
        m_new = jnp.maximum(m_prev, jnp.max(s, axis=-1, keepdims=True))
        alpha = jnp.exp(m_prev - m_new)
        p = jnp.exp(s - m_new)
        l_ref[:, :, hs] = alpha * l_ref[:, :, hs] + jnp.sum(p, axis=-1,
                                                            keepdims=True)
        pv = jnp.einsum("bqk,bkd->bqd", p.astype(_MXU_DTYPE), v_all[:, :, sl],
                        preferred_element_type=jnp.float32)
        acc_ref[:, :, sl] = alpha * acc_ref[:, :, sl] + pv
        m_ref[:, :, hs] = m_new

    @pl.when(ki == pl.num_programs(2) - 1)
    def _finalize():
        # Exact reciprocal (not the approx EUP one) keeps the tolerance tight.
        # Single lane-dense full-width store of all heads at once.
        inv_parts = [
            jnp.broadcast_to(1.0 / l_ref[:, :, h:h + 1], (Bb, tLq, d))
            for h in range(num_heads)
        ]
        inv_full = jnp.concatenate(inv_parts, axis=-1)           # (Bb, tLq, H)
        o_ref[...] = (acc_ref[...] * inv_full).astype(o_ref.dtype)


def _attention(qh, kh, vh, vl, num_heads):
    """qh: (B, Lq, H), kh/vh: (B, Lk, H), vl: (B, 1, 1) int32 -> (B, Lq, H)."""
    B, Lq, H = qh.shape
    Lk = kh.shape[1]
    # Big Lq/Lk tiles keep the MXU busy (2x256x256 on v6e/v7x) while the grid
    # still has multiple steps for DMA/compute overlap and megacore sharding.
    tLq = _pick_tile(Lq, 256, 8)
    tLk = _pick_tile(Lk, 512, 128)
    grid = (B, Lq // tLq, Lk // tLk)
    itemsize = jnp.dtype(qh.dtype).itemsize
    cost = pl.CostEstimate(
        flops=4 * B * Lq * Lk * H,
        transcendentals=B * num_heads * Lq * Lk,
        bytes_accessed=(2 * B * Lq * H + 2 * B * Lk * H) * itemsize)
    kernel = functools.partial(_attn_kernel, num_heads=num_heads)
    return pl.pallas_call(
        kernel,
        out_shape=jax.ShapeDtypeStruct((B, Lq, H), qh.dtype),
        grid=grid,
        in_specs=[
            pl.BlockSpec((1, tLq, H), lambda b, qi, ki: (b, qi, 0)),
            pl.BlockSpec((1, tLk, H), lambda b, qi, ki: (b, ki, 0)),
            pl.BlockSpec((1, tLk, H), lambda b, qi, ki: (b, ki, 0)),
            pl.BlockSpec((1, 1, 1), lambda b, qi, ki: (b, 0, 0)),
        ],
        out_specs=pl.BlockSpec((1, tLq, H), lambda b, qi, ki: (b, qi, 0)),
        scratch_shapes=[
            pltpu.VMEM((1, tLq, num_heads), jnp.float32),  # running max (per head lane)
            pltpu.VMEM((1, tLq, num_heads), jnp.float32),  # running denom
            pltpu.VMEM((1, tLq, H), jnp.float32),          # f32 output accumulator
        ],
        compiler_params=pltpu.CompilerParams(
            dimension_semantics=("parallel", "parallel", "arbitrary"),
            vmem_limit_bytes=_vmem_limit_bytes()),
        cost_estimate=cost,
    )(qh, kh, vh, vl)


# ----------------------------------------------------------------------------
# Module wrapper (glue in plain JAX: reshapes only — no transposes).
# ----------------------------------------------------------------------------
def multi_head_attention(queries, keys, values, valid_lens, params, num_heads):
    """Forward pass of the d2l MultiHeadAttention module (bias=False, eval)."""
    # TODO(synk): training-mode dropout not implemented (identity in eval mode).
    Wq, Wk, Wv, Wo = params
    B, Lq, _ = queries.shape
    _, Lk, _ = keys.shape
    H = Wq.shape[1]

    same_shapes = (queries.shape == keys.shape == values.shape
                   and Wq.shape == Wk.shape == Wv.shape)
    if same_shapes:
        M = B * Lq
        ws = jnp.stack([Wq, Wk, Wv])
        if queries is keys and keys is values:
            xs = queries.reshape(1, M, -1)     # self-attention: no 3x input copy
        else:
            xs = jnp.stack([queries.reshape(M, -1), keys.reshape(M, -1),
                            values.reshape(M, -1)])
        qkv = fused_qkv_linear(xs, ws)         # (3, M, H) in ONE pallas_call
        q2, k2, v2 = qkv[0], qkv[1], qkv[2]
    else:                                      # cross-attention fallback
        q2 = linear(queries.reshape(B * Lq, -1), Wq)
        k2 = linear(keys.reshape(B * Lk, -1), Wk)
        v2 = linear(values.reshape(B * Lk, -1), Wv)

    # No transpose_qkv / transpose_output: heads stay as contiguous d-wide lane
    # slices of H (same math; the attention kernel slices them statically).
    qh = q2.reshape(B, Lq, H)
    kh = k2.reshape(B, Lk, H)
    vh = v2.reshape(B, Lk, H)

    if valid_lens is not None:
        vl = valid_lens.astype(jnp.int32).reshape(B, 1, 1)
    else:
        vl = jnp.full((B, 1, 1), Lk, dtype=jnp.int32)

    out_concat = _attention(qh, kh, vh, vl, num_heads)   # (B, Lq, H)

    return linear(out_concat.reshape(B * Lq, H), Wo).reshape(B, Lq, H)


# ----------------------------------------------------------------------------
# Pure-JAX reference (mirrors the PyTorch code) for verification.
# ----------------------------------------------------------------------------
def reference_mha(queries, keys, values, valid_lens, params, num_heads):
    Wq, Wk, Wv, Wo = params
    B, Lq, _ = queries.shape
    Lk = keys.shape[1]
    H = Wq.shape[1]
    d = H // num_heads
    hp = jax.lax.Precision.HIGHEST

    def t_qkv(x):
        B_, L_, _ = x.shape
        return (x.reshape(B_, L_, num_heads, d)
                .transpose(0, 2, 1, 3)
                .reshape(B_ * num_heads, L_, d))

    q = t_qkv(jnp.matmul(queries, Wq, precision=hp))
    k = t_qkv(jnp.matmul(keys, Wk, precision=hp))
    v = t_qkv(jnp.matmul(values, Wv, precision=hp))

    scores = jnp.einsum("bqd,bkd->bqk", q, k, precision=hp) / math.sqrt(d)
    if valid_lens is not None:
        vl_rep = jnp.repeat(valid_lens.astype(jnp.int32), num_heads)
        col = jnp.arange(Lk)[None, None, :]
        scores = jnp.where(col < vl_rep[:, None, None], scores, _NEG_MASK)
    attn = jax.nn.softmax(scores, axis=-1)
    out = jnp.einsum("bqk,bkd->bqd", attn, v, precision=hp)
    out_concat = (out.reshape(B, num_heads, Lq, d)
                  .transpose(0, 2, 1, 3)
                  .reshape(B, Lq, H))
    return jnp.matmul(out_concat, Wo, precision=hp)


if __name__ == "__main__":
    def run_case(name, B, Lq, Lk, in_dim, H, nh, valid_lens,
                 self_attn=False, seed=0):
        key = jax.random.PRNGKey(seed)
        kq, kk, kv, kwq, kwk, kwv, kwo = jax.random.split(key, 7)
        if self_attn:
            X = jax.random.normal(kq, (B, Lq, in_dim), jnp.float32)
            queries = keys = values = X
        else:
            queries = jax.random.normal(kq, (B, Lq, in_dim), jnp.float32)
            keys = jax.random.normal(kk, (B, Lk, in_dim), jnp.float32)
            values = jax.random.normal(kv, (B, Lk, in_dim), jnp.float32)
        scale = 0.1
        Wq = scale * jax.random.normal(kwq, (in_dim, H), jnp.float32)
        Wk = scale * jax.random.normal(kwk, (in_dim, H), jnp.float32)
        Wv = scale * jax.random.normal(kwv, (in_dim, H), jnp.float32)
        Wo = scale * jax.random.normal(kwo, (H, H), jnp.float32)
        params = (Wq, Wk, Wv, Wo)

        out = multi_head_attention(queries, keys, values, valid_lens, params, nh)
        out = jax.block_until_ready(out)
        ref = reference_mha(queries, keys, values, valid_lens, params, nh)
        np.testing.assert_allclose(np.asarray(out), np.asarray(ref),
                                   rtol=1e-2, atol=1e-2, err_msg=name)
        assert out.shape == (B, Lq, H), name

    # 1) The module's canonical small shapes (batch=2, seq=8, hidden=32, heads=4).
    run_case("small", B=2, Lq=8, Lk=8, in_dim=32, H=32, nh=4,
             valid_lens=jnp.array([3, 6], dtype=jnp.int32))
    # 2) Cross-attention exercising Lq tiling and online softmax across Lk tiles.
    run_case("tiled", B=2, Lq=512, Lk=1024, in_dim=48, H=64, nh=4,
             valid_lens=jnp.array([100, 1000], dtype=jnp.int32), seed=1)
    # 3) Self-attention (q is k is v: single-x fused projection path), no mask.
    run_case("selfattn", B=2, Lq=128, Lk=128, in_dim=32, H=32, nh=8,
             valid_lens=None, self_attn=True, seed=2)

    print("KERNEL_OK")
</pallas_src>

<mosaic_0001>
module attributes {stable_mosaic.version = 11 : i64} {
  func.func @_qkv_matmul_kernel(%arg0: i32, %arg1: i32, %arg2: i32, %arg3: i32, %arg4: memref<1x16x32xf32, #tpu.memory_space<vmem>>, %arg5: memref<1x32x32xf32, #tpu.memory_space<vmem>>, %arg6: memref<1x16x32xf32, #tpu.memory_space<vmem>>, %arg7: memref<16x32xf32, #tpu.memory_space<vmem>>) attributes {dimension_semantics = [#tpu.dimension_semantics<parallel>, #tpu.dimension_semantics<parallel>, #tpu.dimension_semantics<parallel>, #tpu.dimension_semantics<arbitrary>], iteration_bounds = array<i64: 3, 1, 1, 1>, scalar_prefetch = 0 : i64, scratch_operands = 1 : i64, tpu.core_type = #tpu.core_type<tc>, window_params = [{transform_indices = @transform_0, window_bounds = array<i64: 1, 16, 32>}, {transform_indices = @transform_1, window_bounds = array<i64: 1, 32, 32>}, {transform_indices = @transform_2, window_bounds = array<i64: 1, 16, 32>}]} {
    %c0_i32 = arith.constant 0 : i32
    %0 = arith.cmpi eq, %arg3, %c0_i32 : i32
    %1 = arith.extui %0 : i1 to i32
    %c0_i32_0 = arith.constant 0 : i32
    %2 = arith.cmpi ne, %1, %c0_i32_0 : i32
    scf.if %2 {
      %cst_12 = arith.constant 0.000000e+00 : f32
      %14 = vector.broadcast %cst_12 : f32 to vector<16x32xf32>
      %c0_13 = arith.constant 0 : index
      %c0_14 = arith.constant 0 : index
      %15 = vector.load %arg7[%c0_13, %c0_14] : memref<16x32xf32, #tpu.memory_space<vmem>>, vector<16x32xf32>
      tpu.vector_store %arg7[%c0_13, %c0_14], %14 {strides = array<i32>} : memref<16x32xf32, #tpu.memory_space<vmem>>, vector<16x32xf32>,
    } else {
    }
    %c0 = arith.constant 0 : index
    %c0_1 = arith.constant 0 : index
    %3 = vector.load %arg7[%c0, %c0_1] : memref<16x32xf32, #tpu.memory_space<vmem>>, vector<16x32xf32>
    %c0_2 = arith.constant 0 : index
    %c0_3 = arith.constant 0 : index
    %c0_4 = arith.constant 0 : index
    %4 = vector.load %arg4[%c0_2, %c0_3, %c0_4] : memref<1x16x32xf32, #tpu.memory_space<vmem>>, vector<1x16x32xf32>
    %5 = vector.shape_cast %4 : vector<1x16x32xf32> to vector<16x32xf32>
    %c0_5 = arith.constant 0 : index
    %c0_6 = arith.constant 0 : index
    %c0_7 = arith.constant 0 : index
    %6 = vector.load %arg5[%c0_5, %c0_6, %c0_7] : memref<1x32x32xf32, #tpu.memory_space<vmem>>, vector<1x32x32xf32>
    %7 = vector.shape_cast %6 : vector<1x32x32xf32> to vector<32x32xf32>
    %cst = arith.constant dense<0.000000e+00> : vector<16x32xf32>
    %8 = tpu.matmul %5, %7, %cst {dimension_numbers = #tpu.dot_dimension_numbers<[1], [0], [0], [1], [0, 0, 1, 1], [], []>} : vector<16x32xf32>, vector<32x32xf32>, vector<16x32xf32> -> vector<16x32xf32>
    %9 = arith.addf %3, %8 : vector<16x32xf32>
    %c0_8 = arith.constant 0 : index
    %c0_9 = arith.constant 0 : index
    %10 = vector.load %arg7[%c0_8, %c0_9] : memref<16x32xf32, #tpu.memory_space<vmem>>, vector<16x32xf32>
    tpu.vector_store %arg7[%c0_8, %c0_9], %9 {strides = array<i32>} : memref<16x32xf32, #tpu.memory_space<vmem>>, vector<16x32xf32>,
    %c0_i32_10 = arith.constant 0 : i32
    %11 = arith.cmpi eq, %arg3, %c0_i32_10 : i32
    %12 = arith.extui %11 : i1 to i32
    %c0_i32_11 = arith.constant 0 : i32
    %13 = arith.cmpi ne, %12, %c0_i32_11 : i32
    scf.if %13 {
      %c0_12 = arith.constant 0 : index
      %c0_13 = arith.constant 0 : index
      %14 = vector.load %arg7[%c0_12, %c0_13] : memref<16x32xf32, #tpu.memory_space<vmem>>, vector<16x32xf32>
      %c0_14 = arith.constant 0 : index
      %c0_15 = arith.constant 0 : index
      %c0_16 = arith.constant 0 : index
      %15 = vector.load %arg6[%c0_14, %c0_15, %c0_16] : memref<1x16x32xf32, #tpu.memory_space<vmem>>, vector<1x16x32xf32>
      %16 = vector.shape_cast %15 : vector<1x16x32xf32> to vector<16x32xf32>
      %17 = vector.shape_cast %14 : vector<16x32xf32> to vector<1x16x32xf32>
      tpu.vector_store %arg6[%c0_14, %c0_15, %c0_16], %17 {strides = array<i32>} : memref<1x16x32xf32, #tpu.memory_space<vmem>>, vector<1x16x32xf32>,
    } else {
    }
    return
  }
  func.func @transform_0(%arg0: i32, %arg1: i32, %arg2: i32, %arg3: i32) -> (i32, i32, i32) {
    %c0_i32 = arith.constant 0 : i32
    return %arg0, %arg1, %arg3 : i32, i32, i32
  }
  func.func @transform_1(%arg0: i32, %arg1: i32, %arg2: i32, %arg3: i32) -> (i32, i32, i32) {
    %c0_i32 = arith.constant 0 : i32
    return %arg0, %arg3, %arg2 : i32, i32, i32
  }
  func.func @transform_2(%arg0: i32, %arg1: i32, %arg2: i32, %arg3: i32) -> (i32, i32, i32) {
    %c0_i32 = arith.constant 0 : i32
    return %arg0, %arg1, %arg2 : i32, i32, i32
  }
}

</mosaic_0001>

<bundles_post_ra>
// kernel: tpu_custom_call.1
= control target key start
LH: loop header
LB: loop body
LE: loop exit
PB: predicated region body
PF: predicated region fallthrough
CT: control target
= control target key end

     0   :  { %7 = vsyncpa [#allocation4], 0  ;;  %s872_s0 = inlined_call_operand.hbm [shape: f32[3,16,32], index: 0, kind: input, shape index: {}]   ;;  %s873_s1 = inlined_call_operand.hbm [shape: f32[3,32,32], index: 1, kind: input, shape index: {}]   ;;  %s874_s2 = inlined_call_operand.hbm [shape: f32[3,16,32], index: 2, kind: output, shape index: {}]  }
   0x1   :  { %9 = vsyncpa [#allocation4 + $0x1], 0 }
   0x2   :  { %10 = vsyncpa [#allocation7], 0 }
   0x3   :  { %12 = vsyncpa [#allocation7 + $0x1], 0 }
   0x4   :  { %13 = vsyncpa [#allocation5], 0 }
   0x5   :  { %15 = vsyncpa [#allocation5 + $0x1], 0  ;;  %s718_s9 = smov 0   ;;  %s720_s10 = smov 0  }
   0x6   :  { %s722_s11 = smov 0   ;;  %s724_s12 = smov 0  }
   0x7   :  { %s726_s13 = smov 0   ;;  %s728_s14 = smov 0  }
   0x8 LB: > { %s450_s15 = sadd.s32 4294967295, %s696_s14   ;;  %s451_s16 = sadd.s32 4294967294, %s696_s14   ;;  %s696_s14 = sphi %s728_s14, %s21_s14   ;;  %s692_s13 = sphi %s726_s13, %s884_s13   ;;  %s688_s12 = sphi %s724_s12, %s883_s12   ;;  %s684_s11 = sphi %s722_s11, %s882_s11   ;;  %s680_s10 = sphi %s720_s10, %s881_s10   ;;  %s676_s9 = sphi %s718_s9, %s880_s9  }
   0x9   : > { %s47_s17 = sadd.s32 1, %s692_s13  ;;  %s58_s18 = sadd.s32 1, %s684_s11 }
   0xa   : > { %p49_p0 = scmp.ge.s32.totalorder %s47_s17, 3  ;;  %p65_p1 = scmp.ne.s32.totalorder %s684_s11, %s680_s10 }
   0xb   : > { %p66_p2 = scmp.eq.s32.totalorder %s696_s14, 0  ;;  %p71_p3 = scmp.ne.s32.totalorder %s680_s10, %s676_s9 }
   0xc   : > { %s886_s17 = smov (%p49_p0, %s47_s17), 0  ;;  %p72_p5 = scmp.eq.s32.totalorder %s450_s15, 0 }
   0xd   : > { %p759_p4 = por %p66_p2, %p65_p1  ;;  %s51_s20 = ssub.s32 %s692_s13, %s886_s17 }
   0xe   : > { %p129_p6 = scmp.eq.s32.totalorder %s450_s15, 2  ;;  %p56_p7 = scmp.eq.s32.totalorder %s51_s20, 0 }
   0xf   : > { %p765_p8 = por %p72_p5, %p71_p3  ;;  %p135_p10 = scmp.eq.s32.totalorder %s451_s16, 2 }
  0x10   : > { %p769_p9 = por %p129_p6, %p65_p1  ;;  %p495_p12 = scmp.lt.s32.totalorder %s696_s14, 3 }
  0x11   : > { %s774_s23 = scalar_select %p56_p7, %s684_s11, %s58_s18  }
  0x12   : > { %p776_p11 = por %p135_p10, %p71_p3  ;;  %s782_s25 = sand.u32 1, %s684_s11  }
  0x13   : > { %s454_s26 = sshll.u32 %s782_s25, 4  ;;  %s471_s27 = sshll.u32 %s692_s13, 4 }
  0x14   : > { %s167_s30 = scalar_lea.hbm %s872_s0, %s471_s27  ;;  %s159_s3 = scalar_lea.vmem [#allocation3], %s454_s26 }
  0x15   : > { %s170_s4 = sshll.u32 %s159_s3, 4  ;;  %s168_s5 = sshll.u32 %s167_s30, 4  ;;  %s171_s4 = int_to_ptr.vmem [resolvable:$true] %s170_s4  ;;  %s169_s5 = int_to_ptr.hbm [resolvable:$true] %s168_s5 }
  0x16   : > { %p791_p13 = pnand %p495_p12, %p759_p4  ;;  %p460_p0 = scmp.ge.s32.totalorder %s696_s14, 1 }
  0x17   : > { %s156_s7 = scalar_lea.sflag [#allocation4], %s782_s25  ;;  %s698_s8 = smov 128  }
  0x18   : > { %s699_s15 = smov 8   ;;  %p203_p1 = scmp.lt.s32.totalorder %s696_s14, 4 }
  0x19   : > { %487 = dma.hbm_to_vmem [thread:$0]  (!%p791_p13), %s169_s5, 256, %s171_s4, %s156_s7, %s698_s8, %s698_s8, %s699_s15  }
  0x1a   : > { %s457_s16 = sshll.u32 %s782_s25, 5  ;;  %s472_s18 = sshll.u32 %s692_s13, 5 }
  0x1b   : > { %p204_p2 = pnand %p460_p0, %p203_p1  ;;  %s192_s19 = scalar_lea.hbm %s873_s1, %s472_s18 }
  0x1c   : > { %s184_s27 = scalar_lea.vmem [#allocation6], %s457_s16  ;;  %s193_s29 = sshll.u32 %s192_s19, 4  ;;  %s194_s29 = int_to_ptr.hbm [resolvable:$true] %s193_s29 }
  0x1d   : > { %s195_s28 = sshll.u32 %s184_s27, 4  ;;  %s181_s30 = scalar_lea.sflag [#allocation7], %s782_s25  ;;  %s196_s28 = int_to_ptr.vmem [resolvable:$true] %s195_s28 }
  0x1e   : > { %490 = dma.hbm_to_vmem [thread:$0]  (!%p791_p13), %s194_s29, 512, %s196_s28, %s181_s30, %s698_s8, %s698_s8, %s699_s15  }
  0x1f   : > { %207 = sbr.rel (%p204_p2) target bundleno = 189 (0xbd), region = 28  ;;  %s809_s3 = sand.u32 (!%p204_p2), 1, %s680_s10  }
  0x20   : > { %s461_s4 = sshll.u32 (!%p204_p2), %s809_s3, 4  ;;  %s210_s5 = scalar_lea.sflag (!%p204_p2), [#allocation4], %s809_s3 }
  0x21   : > { %s213_s7 = scalar_lea.vmem (!%p204_p2), [#allocation3], %s461_s4 }
  0x24   : > { %663 = dma.done.wait (%p765_p8), %s210_s5, 256  }
  0x25   : > { %665 = vsyncadd (%p765_p8), %s210_s5, 4294967040  ;;  %s462_s25 = sshll.u32 %s809_s3, 5  ;;  %s220_s6 = scalar_lea.sflag [#allocation7], %s809_s3 }
  0x26   : > { %s223_s8 = scalar_lea.vmem [#allocation6], %s462_s25 }
  0x27   : > { %667 = dma.done.wait (%p765_p8), %s220_s6, 512  }
  0x28   : > { %669 = vsyncadd (%p765_p8), %s220_s6, 4294966784  ;;  %vm257_vm0 = vcmask 261120   ;;  %v700_v0 = vmov 0.0   ;;  %v267_v1 = vld [vmem:[%s223_s8 + $0x18] sm:$0xff]  ;;  %v266_v2 = vld [vmem:[%s223_s8 + $0x10] sm:$0xff]  ;;  %s473_s21 = sshll.u32 %s688_s12, 4 }
  0x29   : > { %258 = vst.msk [vmem:[#allocation2] sm:$0xff] %vm257_vm0, %v700_v0  ;;  %287 = vmatpush.msra.mxu0 %v267_v1  ;;  %474 = vmatpush.msra.mxu1 %v267_v1  ;;  %v265_v3 = vld [vmem:[%s223_s8 + $0x8] sm:$0xff]  ;;  %v264_v4 = vld [vmem:[%s223_s8] sm:$0xff]  ;;  %s324_s18 = scalar_lea.hbm %s874_s2, %s473_s21  ;;  %s249_s20 = scalar_lea.vmem [#allocation8], %s461_s4 }
  0x2a   : > { %259 = vst.msk [vmem:[#allocation2 + $0x8] sm:$0xff] %vm257_vm0, %v700_v0  ;;  %v262_v5 = vld [vmem:[%s213_s7] sm:$0xff]  ;;  %v263_v6 = vld [vmem:[%s213_s7 + $0x8] sm:$0xff]  ;;  %s325_s26 = sshll.u32 %s249_s20, 4  ;;  %s327_s19 = sshll.u32 %s324_s18, 4  ;;  %s326_s26 = int_to_ptr.vmem [resolvable:$true] %s325_s26  ;;  %s328_s19 = int_to_ptr.hbm [resolvable:$true] %s327_s19 }
  0x2b   : > { %288 = vmatpush.msra.mxu0 %v266_v2  ;;  %475 = vmatpush.msra.mxu1 %v266_v2  ;;  %s310_s12 = scalar_lea.sflag [#allocation5], %s809_s3  ;;  %s624_s27 = sshra.s32 %s328_s19, 4  ;;  %s625_s27 = int_to_ptr.hbm [resolvable:$true] %s624_s27 }
  0x2c   : > { %s626_s28 = scalar_lea.hbm %s625_s27, 16  ;;  %s630_s4 = scalar_lea.hbm %s874_s2, 48 }
  0x2d   : > { %289 = vmatpush.msra.mxu0 %v265_v3  ;;  %476 = vmatpush.msra.mxu1 %v265_v3  ;;  %p627_p3 = scmp.ne.s32.totalorder %s625_s27, %s626_s28  ;;  %p631_p6 = scmp.lt.s32.totalorder %s625_s27, %s874_s2 }
  0x2e   : > { %p632_p7 = scmp.lt.s32.totalorder %s630_s4, %s626_s28 }
  0x2f   : > { %290 = vmatpush.msra.mxu0 %v264_v4  ;;  %477 = vmatpush.msra.mxu1 %v264_v4  ;;  %p628_p4 = pnand %p627_p3, %p769_p9 }
  0x30   : > { %464 = vmatmul.msk.f32.vlgmr.msra.gmra.mxu0 %vm257_vm0, %v262_v5  ;;  %465 = vmatmul.msk.f32.vlgmr.msra.gmra.mxu1 %vm257_vm0, %v263_v6  ;;  %v260_v7 = vld [vmem:[#allocation2] sm:$0xff]  ;;  %p633_p8 = por %p632_p7, %p631_p6 }
  0x31   : > { %v261_v8 = vld [vmem:[#allocation2 + $0x8] sm:$0xff]  ;;  %p629_p5 = pneg %p628_p4 }
  0x33   : > { %p634_p10 = pnand %p633_p8, %p629_p5 }
  0xad   : > { %v292_v9 = vpop.f32.mrf.mxu0  ;;  %v295_v10 = vpop.f32.mrf.mxu1 }
  0xae   : > { %v298_v11 = vadd.f32 %v292_v9, %v260_v7  ;;  %v299_v12 = vadd.f32 %v295_v10, %v261_v8 }
  0xb0   : > { %300 = vst.msk [vmem:[#allocation2] sm:$0xff] %vm257_vm0, %v298_v11 }
  0xb1   : > { %301 = vst.msk [vmem:[#allocation2 + $0x8] sm:$0xff] %vm257_vm0, %v299_v12 }
  0xb7   : > { %v305_v13 = vld [vmem:[#allocation2] sm:$0xff] }
  0xb8   : > { %v306_v14 = vld [vmem:[#allocation2 + $0x8] sm:$0xff]  ;;  %307 = vst.msk [vmem:[%s249_s20] sm:$0xff] %vm257_vm0, %v305_v13 }
  0xb9   : > { %308 = vst.msk [vmem:[%s249_s20 + $0x8] sm:$0xff] %vm257_vm0, %v306_v14 }
  0xba   : > { %637 = shalt.err (!%p634_p10)
}
  0xbb   : > { %s701_s3 = smov 128   ;;  %s702_s25 = smov 8  }
  0xbc   : > { %482 = dma.vmem_to_hbm [thread:$0]  (%p769_p9), %s326_s26, 256, %s328_s19, %s310_s12, %s701_s3, %s701_s3, %s702_s25  }
  0xbd PF: > { %p496_p12 = scmp.ge.s32.totalorder %s696_s14, 2  ;;  %s342_s6 = sand.u32 1, %s676_s9  }
  0xbe   : > { %s343_s8 = scalar_lea.sflag [#allocation5], %s342_s6 }
  0xbf   : > { %p492_p13 = pnand %p496_p12, %p776_p11 }
  0xc1   : > { %p493_p0 = pneg %p492_p13 }
  0xc3   : > { %671 = dma.done.wait (%p493_p0), %s343_s8, 256  }
  0xc4   : > { %673 = vsyncadd (%p493_p0), %s343_s8, 4294967040  ;;  %s21_s14 = sadd.s32 1, %s696_s14   ;;  %s880_s9 = smov %s680_s10 }
  0xc5   : > { %p18_p1 = scmp.ge.s32.totalorder %s21_s14, 5   ;;  %s881_s10 = smov %s684_s11 }
  0xc6   : > { %s882_s11 = smov %s774_s23  ;;  %s883_s12 = smov %s692_s13 }
  0xc7   : > { %s884_s13 = smov %s886_s17  ;;  %20 = sbr.rel (!%p18_p1) target bundleno = 8 (0x8), region = 94 }
  0xcc   :  { %349 = vsyncpa [#allocation4], 1 }
  0xcd   :  { %351 = vsyncpa [#allocation4 + $0x1], 1 }
  0xce   :  { %352 = vsyncpa [#allocation7], 1 }
  0xcf   :  { %354 = vsyncpa [#allocation7 + $0x1], 1 }
  0xd0   :  { %355 = vsyncpa [#allocation5], 1 }
  0xd1   :  { %357 = vsyncpa [#allocation5 + $0x1], 1 }

</bundles_post_ra>
